<compile_context>
chip_gen: v6e
topology: v6e:2x2x1
jax: 0.10.0
libtpu: 0.0.40
codegen_flags: <defaults>
</compile_context>

<pallas_src>
import functools

import jax
import jax.numpy as jnp
from jax import lax
from jax.experimental import pallas as pl
from jax.experimental.pallas import tpu as pltpu


def _round_up(a, m):
    return ((a + m - 1) // m) * m


def _catavgmax_kernel(x_ref, avg_ref, max_ref, *scratch,
                      hw, thw, inv_hw, need_mask, n_k):
    # x_ref: (1, tc, thw); avg_ref/max_ref: (1, tc, 1)
    if n_k == 1:
        # Single reduction step: write outputs directly, no accumulator traffic.
        x = x_ref[...]
        if need_mask:
            idx = lax.broadcasted_iota(jnp.int32, x.shape, 2)
            valid = idx < hw
            xs = jnp.where(valid, x.astype(jnp.float32), 0.0)
            xm = jnp.where(valid, x, -jnp.inf)
        else:
            xs = x.astype(jnp.float32)
            xm = x
        avg_ref[...] = (jnp.sum(xs, axis=-1, keepdims=True) * inv_hw
                        ).astype(avg_ref.dtype)
        max_ref[...] = jnp.max(xm, axis=-1, keepdims=True).astype(max_ref.dtype)
        return

    sum_acc, max_acc = scratch
    k = pl.program_id(2)

    @pl.when(k == 0)
    def _init():
        sum_acc[...] = jnp.zeros_like(sum_acc)
        max_acc[...] = jnp.full_like(max_acc, -jnp.inf)

    def _accumulate(masked):
        x = x_ref[...]
        if masked:
            idx = lax.broadcasted_iota(jnp.int32, x.shape, 2)
            valid = (k * thw + idx) < hw
            xs = jnp.where(valid, x.astype(jnp.float32), 0.0)   # 0 for sum
            xm = jnp.where(valid, x, -jnp.inf)                   # -inf for max
        else:
            xs = x.astype(jnp.float32)
            xm = x
        sum_acc[...] += jnp.sum(xs, axis=-1, keepdims=True)
        max_acc[...] = jnp.maximum(
            max_acc[...],
            jnp.max(xm, axis=-1, keepdims=True).astype(jnp.float32))

    if need_mask:
        # Mask only on the final ragged tile; full tiles take the cheap path.
        @pl.when(k < n_k - 1)
        def _full():
            _accumulate(False)

        @pl.when(k == n_k - 1)
        def _last():
            _accumulate(True)
    else:
        _accumulate(False)

    @pl.when(k == n_k - 1)
    def _finalize():
        avg_ref[...] = (sum_acc[...] * inv_hw).astype(avg_ref.dtype)
        max_ref[...] = max_acc[...].astype(max_ref.dtype)


def _default_block_bytes():
    """Generation-aware input-block budget."""
    try:
        kind = jax.devices()[0].device_kind.lower()
    except Exception:  # pragma: no cover
        return 8 * 1024 * 1024
    if "v5 lite" in kind or "v5lite" in kind or "v5e" in kind:
        return 6 * 1024 * 1024      # v5e: 16 MiB default scoped VMEM headroom
    if "v7" in kind:
        return 12 * 1024 * 1024     # v7x: 3.2 TB/s HBM, 64 MiB VMEM
    return 8 * 1024 * 1024          # v6e / v4 / default


def _choose_tiles(n, c, hw, itemsize, budget):
    """Returns (tc, thw, n_c, n_k)."""
    hw_pad = _round_up(hw, 128)          # lane-padded VMEM footprint per channel
    row_bytes = hw_pad * itemsize
    min_tc = c if c < 8 else 8

    if min_tc * row_bytes <= budget:
        # ---- Whole-HW blocks: single reduction step, no mask, no scratch. ----
        thw = hw
        n_k = 1
        if c <= 8:
            tc = c
        else:
            tc_cap = (budget // row_bytes) // 8 * 8   # >= 8 by branch condition
            tc = c if c <= tc_cap else tc_cap
        # Guarantee >= 2 parallel blocks for v7x's two TensorCores when N == 1.
        if n == 1 and tc == c and c > 8:
            tc = _round_up(pl.cdiv(c, 2), 8)
    else:
        # ---- Large feature map: balanced, 128-aligned HW reduction tiles. ----
        tc = min_tc
        max_thw = max(128, (budget // (tc * itemsize)) // 128 * 128)
        n_k = pl.cdiv(hw, max_thw)
        thw = _round_up(pl.cdiv(hw, n_k), 128)
        n_k = pl.cdiv(hw, thw)

    n_c = pl.cdiv(c, tc)
    return tc, thw, n_c, n_k


def adaptive_catavgmax_pool2d(x, output_size=1, *, max_block_bytes=None):
    """x: (N, C, H, W) float -> (N, 2C, 1, 1). output_size must be 1."""
    assert output_size in (1, (1, 1)), "only global (output_size=1) pooling implemented"
    assert jnp.issubdtype(x.dtype, jnp.floating), "floating-point input required"
    n, c, h, w = x.shape
    hw = h * w

    # Native layout; free reshape (no HBM transpose pass).
    x3 = x.reshape(n, c, hw)

    itemsize = jnp.dtype(x.dtype).itemsize
    if max_block_bytes is None:
        max_block_bytes = _default_block_bytes()
    tc, thw, n_c, n_k = _choose_tiles(n, c, hw, itemsize, max_block_bytes)
    need_mask = (thw * n_k) != hw   # ragged trailing tile (or thw > hw)

    kernel = functools.partial(
        _catavgmax_kernel,
        hw=hw, thw=thw, inv_hw=float(1.0 / hw), need_mask=need_mask, n_k=n_k)

    # Scratch accumulators only needed for multi-step reductions.
    scratch_shapes = [] if n_k == 1 else [pltpu.VMEM((1, tc, 1), jnp.float32),
                                          pltpu.VMEM((1, tc, 1), jnp.float32)]

    # VMEM budget: double-buffered input block + double-buffered outputs +
    # accumulators, lane-padded, plus headroom.  Capped for v7x's 64 MiB.
    tc_pad = _round_up(tc, 8)
    block_pad = tc_pad * _round_up(thw, 128) * itemsize
    out_pad = tc_pad * 128 * itemsize
    acc_pad = tc_pad * 128 * 4
    vmem_need = 2 * block_pad + 4 * out_pad + (0 if n_k == 1 else 2 * acc_pad)
    vmem_limit = int(min(48 * 1024 * 1024,
                         max(16 * 1024 * 1024, vmem_need + (4 << 20))))

    cost = pl.CostEstimate(
        flops=2 * n * c * hw,
        transcendentals=0,
        bytes_accessed=n * c * hw * itemsize + 2 * n * c * itemsize)

    avg, mx = pl.pallas_call(
        kernel,
        out_shape=(jax.ShapeDtypeStruct((n, c, 1), x.dtype),
                   jax.ShapeDtypeStruct((n, c, 1), x.dtype)),
        grid_spec=pltpu.PrefetchScalarGridSpec(
            num_scalar_prefetch=0,
            grid=(n, n_c, n_k),
            in_specs=[pl.BlockSpec((1, tc, thw), lambda i, j, k: (i, j, k))],
            out_specs=(pl.BlockSpec((1, tc, 1), lambda i, j, k: (i, j, 0)),
                       pl.BlockSpec((1, tc, 1), lambda i, j, k: (i, j, 0))),
            scratch_shapes=scratch_shapes),
        compiler_params=pltpu.CompilerParams(
            dimension_semantics=("parallel", "parallel", "arbitrary"),
            vmem_limit_bytes=vmem_limit),
        cost_estimate=cost,
    )(x3)

    # Tiny concat/reshape on (N, C, 1) results -> (N, 2C, 1, 1).
    return jnp.concatenate([avg, mx], axis=1).reshape(n, 2 * c, 1, 1)


class AdaptiveCatAvgMaxPool2d:
    def __init__(self, output_size=1):
        self.output_size = output_size

    def __call__(self, x):
        return adaptive_catavgmax_pool2d(x, self.output_size)


if __name__ == "__main__":
    def reference(x):
        avg_ref = jnp.mean(x.astype(jnp.float32), axis=(2, 3), keepdims=True)
        max_ref = jnp.max(x.astype(jnp.float32), axis=(2, 3), keepdims=True)
        return jnp.concatenate([avg_ref, max_ref], axis=1)

    # Case 1: module default at small shape — whole-HW single-step path.
    N, C, H, W = 2, 4, 16, 16
    x = jax.random.normal(jax.random.PRNGKey(0), (N, C, H, W), dtype=jnp.float32)
    mod = AdaptiveCatAvgMaxPool2d(output_size=1)
    out = jax.block_until_ready(mod(x))
    assert out.shape == (N, 2 * C, 1, 1), out.shape
    assert jnp.allclose(out, reference(x), atol=1e-5, rtol=1e-5), "case 1 mismatch"

    # Case 2: forced tiled + ragged HW reduction (thw=128 < hw=400, masked last tile).
    x2 = jax.random.normal(jax.random.PRNGKey(1), (2, 4, 20, 20), dtype=jnp.float32)
    out2 = jax.block_until_ready(adaptive_catavgmax_pool2d(x2, max_block_bytes=2048))
    assert out2.shape == (2, 8, 1, 1), out2.shape
    assert jnp.allclose(out2, reference(x2), atol=1e-5, rtol=1e-5), "case 2 mismatch"

    # Case 3: balanced multi-step tiling with no ragged tile, bf16 native-dtype max.
    x3 = jax.random.normal(jax.random.PRNGKey(2), (1, 4, 16, 32), dtype=jnp.bfloat16)
    out3 = jax.block_until_ready(adaptive_catavgmax_pool2d(x3, max_block_bytes=2048))
    assert out3.shape == (1, 8, 1, 1), out3.shape
    assert jnp.allclose(out3.astype(jnp.float32), reference(x3),
                        atol=2e-2, rtol=2e-2), "case 3 mismatch"

    # Case 4: N==1 channel split for v7x parallelism + ragged final C block.
    x4 = jax.random.normal(jax.random.PRNGKey(3), (1, 20, 4, 4), dtype=jnp.float32)
    out4 = jax.block_until_ready(adaptive_catavgmax_pool2d(x4))
    assert out4.shape == (1, 40, 1, 1), out4.shape
    assert jnp.allclose(out4, reference(x4), atol=1e-5, rtol=1e-5), "case 4 mismatch"

    # Case 5: classifier-head style shape (large C, tiny HW) — big single block.
    x5 = jax.random.normal(jax.random.PRNGKey(4), (2, 256, 7, 7), dtype=jnp.float32)
    out5 = jax.block_until_ready(adaptive_catavgmax_pool2d(x5))
    assert out5.shape == (2, 512, 1, 1), out5.shape
    assert jnp.allclose(out5, reference(x5), atol=1e-5, rtol=1e-5), "case 5 mismatch"

    print("KERNEL_OK")
</pallas_src>

<mosaic_0001>
module attributes {stable_mosaic.version = 11 : i64} {
  func.func @_catavgmax_kernel(%arg0: i32, %arg1: i32, %arg2: i32, %arg3: memref<1x4x256xf32, #tpu.memory_space<vmem>>, %arg4: memref<1x4x1xf32, #tpu.memory_space<vmem>>, %arg5: memref<1x4x1xf32, #tpu.memory_space<vmem>>) attributes {dimension_semantics = [#tpu.dimension_semantics<parallel>, #tpu.dimension_semantics<parallel>, #tpu.dimension_semantics<arbitrary>], iteration_bounds = array<i64: 2, 1, 1>, scalar_prefetch = 0 : i64, scratch_operands = 0 : i64, tpu.core_type = #tpu.core_type<tc>, window_params = [{transform_indices = @transform_0, window_bounds = array<i64: 1, 4, 256>}, {transform_indices = @transform_1, window_bounds = array<i64: 1, 4, 1>}, {transform_indices = @transform_2, window_bounds = array<i64: 1, 4, 1>}]} {
    %c0 = arith.constant 0 : index
    %c0_0 = arith.constant 0 : index
    %c0_1 = arith.constant 0 : index
    %0 = vector.load %arg3[%c0, %c0_0, %c0_1] : memref<1x4x256xf32, #tpu.memory_space<vmem>>, vector<1x4x256xf32>
    %cst = arith.constant dense<0.000000e+00> : vector<1x4xf32>
    %1 = vector.multi_reduction <add>, %0, %cst [2] : vector<1x4x256xf32> to vector<1x4xf32>
    %2 = vector.shape_cast %1 : vector<1x4xf32> to vector<1x4x1xf32>
    %cst_2 = arith.constant 3.906250e-03 : f32
    %3 = vector.broadcast %cst_2 : f32 to vector<1x4x1xf32>
    %4 = arith.mulf %2, %3 : vector<1x4x1xf32>
    %c0_3 = arith.constant 0 : index
    %c0_4 = arith.constant 0 : index
    %c0_5 = arith.constant 0 : index
    %5 = vector.load %arg4[%c0_3, %c0_4, %c0_5] : memref<1x4x1xf32, #tpu.memory_space<vmem>>, vector<1x4x1xf32>
    tpu.vector_store %arg4[%c0_3, %c0_4, %c0_5], %4 {strides = array<i32>} : memref<1x4x1xf32, #tpu.memory_space<vmem>>, vector<1x4x1xf32>,
    %cst_6 = arith.constant dense<0xFF800000> : vector<1x4xf32>
    %6 = vector.multi_reduction <maximumf>, %0, %cst_6 [2] : vector<1x4x256xf32> to vector<1x4xf32>
    %7 = vector.shape_cast %6 : vector<1x4xf32> to vector<1x4x1xf32>
    %c0_7 = arith.constant 0 : index
    %c0_8 = arith.constant 0 : index
    %c0_9 = arith.constant 0 : index
    %8 = vector.load %arg5[%c0_7, %c0_8, %c0_9] : memref<1x4x1xf32, #tpu.memory_space<vmem>>, vector<1x4x1xf32>
    tpu.vector_store %arg5[%c0_7, %c0_8, %c0_9], %7 {strides = array<i32>} : memref<1x4x1xf32, #tpu.memory_space<vmem>>, vector<1x4x1xf32>,
    return
  }
  func.func @transform_0(%arg0: i32, %arg1: i32, %arg2: i32) -> (i32, i32, i32) {
    %c0_i32 = arith.constant 0 : i32
    return %arg0, %arg1, %arg2 : i32, i32, i32
  }
  func.func @transform_1(%arg0: i32, %arg1: i32, %arg2: i32) -> (i32, i32, i32) {
    %c0_i32 = arith.constant 0 : i32
    %c0_i32_0 = arith.constant 0 : i32
    return %arg0, %arg1, %c0_i32 : i32, i32, i32
  }
  func.func @transform_2(%arg0: i32, %arg1: i32, %arg2: i32) -> (i32, i32, i32) {
    %c0_i32 = arith.constant 0 : i32
    %c0_i32_0 = arith.constant 0 : i32
    return %arg0, %arg1, %c0_i32 : i32, i32, i32
  }
}

</mosaic_0001>

<bundles_post_ra>
// kernel: tpu_custom_call.1
= control target key start
LH: loop header
LB: loop body
LE: loop exit
PB: predicated region body
PF: predicated region fallthrough
CT: control target
= control target key end

     0   :  { %8 = vsyncpa [#allocation3], 0  ;;  %s632_s0 = inlined_call_operand.hbm [shape: f32[2,4,256], index: 0, kind: input, shape index: {}]   ;;  %s633_s1 = inlined_call_operand.vmem [shape: f32[2,4,1], index: 1, kind: output, shape index: {0}]   ;;  %s634_s2 = inlined_call_operand.vmem [shape: f32[2,4,1], index: 2, kind: output, shape index: {1}]  }
   0x1   :  { %10 = vsyncpa [#allocation3 + $0x1], 0  ;;  %s529_s9 = smov 0   ;;  %s531_s10 = smov 0  }
   0x2   :  { %s533_s11 = smov 0   ;;  %s535_s12 = smov 0  }
   0x3   :  { %s537_s13 = smov 0   ;;  %s539_s14 = smov 0  }
   0x4 LB: > { %s363_s15 = sadd.s32 4294967295, %s511_s14   ;;  %s35_s16 = sadd.s32 1, %s507_s13  ;;  %s511_s14 = sphi %s539_s14, %s16_s14   ;;  %s507_s13 = sphi %s537_s13, %s642_s13   ;;  %s503_s12 = sphi %s535_s12, %s641_s12   ;;  %s499_s11 = sphi %s533_s11, %s640_s11   ;;  %s495_s10 = sphi %s531_s10, %s639_s10   ;;  %s491_s9 = sphi %s529_s9, %s638_s9  }
   0x5   : > { %p37_p0 = scmp.ge.s32.totalorder %s35_s16, 2  ;;  %s46_s17 = sadd.s32 1, %s499_s11 }
   0x6   : > { %p53_p1 = scmp.ne.s32.totalorder %s499_s11, %s495_s10  ;;  %p54_p2 = scmp.eq.s32.totalorder %s511_s14, 0 }
   0x7   : > { %s644_s16 = smov (%p37_p0, %s35_s16), 0  ;;  %p59_p4 = scmp.ne.s32.totalorder %s495_s10, %s491_s9 }
   0x8   : > { %p565_p3 = por %p54_p2, %p53_p1  ;;  %s39_s19 = ssub.s32 %s507_s13, %s644_s16 }
   0x9   : > { %p60_p5 = scmp.eq.s32.totalorder %s363_s15, 0  ;;  %p44_p6 = scmp.eq.s32.totalorder %s39_s19, 0 }
   0xa   : > { %p383_p8 = scmp.lt.s32.totalorder %s511_s14, 2  ;;  %s139_s22 = sand.u32 1, %s499_s11  }
   0xb   : > { %p572_p7 = por %p60_p5, %p59_p4  ;;  %s376_s23 = sshll.u32 %s507_s13, 7 }
   0xc   : > { %s578_s21 = scalar_select %p44_p6, %s499_s11, %s46_s17  }
   0xd   : > { %s367_s24 = sshll.u32 %s139_s22, 3  ;;  %s153_s27 = scalar_lea.hbm %s632_s0, %s376_s23 }
   0xe   : > { %s143_s28 = scalar_lea.vmem [#allocation2], %s367_s24  ;;  %p587_p9 = pnand %p383_p8, %p565_p3 }
   0xf   : > { %s155_s29 = sshll.u32 %s143_s28, 4  ;;  %p370_p10 = scmp.ge.s32.totalorder %s511_s14, 1  ;;  %s156_s29 = int_to_ptr.vmem [resolvable:$true] %s155_s29 }
  0x10   : > { %p160_p11 = scmp.lt.s32.totalorder %s511_s14, 3  ;;  %s140_s3 = scalar_lea.sflag [#allocation3], %s139_s22 }
  0x11   : > { %p435_p12 = pneg %p587_p9  ;;  %s446_s4 = scalar_lea.vmem %s156_s29, 128 }
  0x12   : > { %p447_p13 = scmp.ne.s32.totalorder %s156_s29, %s446_s4  ;;  %s513_s5 = smov [#allocation2]  }
  0x13   : > { %s451_s6 = sshll.u32 %s513_s5, 4  ;;  %s452_s6 = int_to_ptr.vmem [resolvable:$false] %s451_s6 }
  0x14   : > { %p449_p0 = pnand %p447_p13, %p435_p12  ;;  %s453_s7 = scalar_lea.vmem %s452_s6, 256 }
  0x15   : > { %p454_p2 = scmp.lt.s32.totalorder %s156_s29, %s452_s6  ;;  %p455_p3 = scmp.lt.s32.totalorder %s453_s7, %s446_s4 }
  0x16   : > { %p450_p1 = pneg %p449_p0 }
  0x17   : > { %p456_p4 = por %p455_p3, %p454_p2 }
  0x19   : > { %p457_p5 = pnand %p456_p4, %p450_p1 }
  0x1b   : > { %460 = shalt.err (!%p457_p5)
}
  0x1c   : > { %382 = dma.hbm_to_vmem [thread:$0]  (!%p587_p9), %s153_s27, 128, %s156_s29, %s140_s3  }
  0x1d   : > { %p161_p6 = pnand %p370_p10, %p160_p11 }
  0x1e   : > { %s166_s8 = sand.u32 (!%p161_p6), 1, %s495_s10  }
  0x1f   : > { %164 = sbr.rel (%p161_p6) target bundleno = 186 (0xba), region = 24  ;;  %s371_s9 = sshll.u32 (!%p161_p6), %s166_s8, 3 }
  0x20   : > { %s167_s15 = scalar_lea.sflag (!%p161_p6), [#allocation3], %s166_s8  ;;  %s170_s17 = scalar_lea.vmem (!%p161_p6), [#allocation2], %s371_s9 }
  0x24   : > { %486 = dma.done.wait (%p572_p7), %s167_s15, 128  }
  0x25   : > { %488 = vsyncadd (%p572_p7), %s167_s15, 4294967168  ;;  %vm219_vm0 = vcmask 1043456   ;;  %v215_v0 = vld [vmem:[%s170_s17] sm:$0xff]  ;;  %p201_p8 = scmp.lt.s32.totalorder %s503_s12, 1  ;;  %vm226_vm1 = vcmask 3072  }
  0x26   : > { %v217_v1 = vcombine.high %v215_v0, %v215_v0  ;;  %v220_v2 = vsel %vm219_vm0, %v215_v0, 0.0  ;;  %v228_v4 = vsel %vm219_vm0, %v215_v0, -inf }
  0x27   : > { %s646_s12 = smov (!%p201_p8, %s503_s12), 1 }
  0x28   : > { %v221_v3 = vsel %vm219_vm0, %v217_v1, 0.0  ;;  %v229_v5 = vsel %vm219_vm0, %v217_v1, -inf  ;;  %s372_s18 = sshll.u32 %s646_s12, 2 }
  0x29   : > { %v222_v6 = vadd.f32 %v221_v3, %v220_v2  ;;  %v230_v7 = vmax.f32 %v228_v4, %v229_v5  ;;  %s207_s22 = scalar_lea.vmem %s633_s1, %s372_s18  ;;  %s214_s25 = scalar_lea.vmem %s634_s2, %s372_s18 }
  0x2b   : > { %223 = vadd.xlane.f32.xlu0 %v222_v6 }
  0x2f   : > { %231 = vmax.xlane.f32.xlu0 %v230_v7 }
  0xb4   : > { %v224_v8 = vpop.xlane.xlu0 %223 }
  0xb5   : > { %v225_v9 = vmul.f32 0.00390625, %v224_v8 }
  0xb7   : > { %227 = vst.msk [vmem:[%s207_s22] sm:$0xf] %vm226_vm1, %v225_v9 }
  0xb8   : > { %v232_v10 = vpop.xlane.xlu0 %231 }
  0xb9   : > { %233 = vst.msk [vmem:[%s214_s25] sm:$0xf] %vm226_vm1, %v232_v10 }
  0xba PF: > { %s16_s14 = sadd.s32 1, %s511_s14   ;;  %s638_s9 = smov %s495_s10 }
  0xbb   : > { %p13_p7 = scmp.ge.s32.totalorder %s16_s14, 4   ;;  %s639_s10 = smov %s499_s11 }
  0xbc   : > { %s640_s11 = smov %s578_s21  ;;  %s641_s12 = smov %s507_s13 }
  0xbd   : > { %s642_s13 = smov %s644_s16  ;;  %15 = sbr.rel (!%p13_p7) target bundleno = 4 (0x4), region = 76 }
  0xc2   :  { %279 = vsyncpa [#allocation3], 1 }
  0xc3   :  { %281 = vsyncpa [#allocation3 + $0x1], 1 }

</bundles_post_ra>
